<compile_context>
chip_gen: v7x
topology: tpu7x:2x2x1
jax: 0.10.0
libtpu: 0.0.40
codegen_flags: <defaults>
</compile_context>

<pallas_src>
import jax
import jax.numpy as jnp
from jax import lax
from jax.experimental import pallas as pl
from jax.experimental.pallas import tpu as pltpu


# --------------------------------------------------------------------------------------
# One-time parameter preparation (done at model-load / init time, NOT per call).
# --------------------------------------------------------------------------------------
def _pick_tile_h(H: int) -> int:
    """Largest convenient lane-aligned tile of the H (output-column) dimension."""
    if H <= 512:
        return H
    for t in (512, 384, 256, 128):
        if H % t == 0 and t % 128 == 0:
            return t
    return H  # fallback: no tiling


def _reorder_gate_cols(w, H: int, tile_h: int):
    """Reorder the 4H gate axis (PyTorch order i|f|g|o) into per-H-tile blocks.

    After reordering, columns [j*4*tile_h : (j+1)*4*tile_h] hold [i_j | f_j | g_j | o_j],
    i.e. everything needed to produce output columns j*tile_h:(j+1)*tile_h.
    """
    n = H // tile_h
    lead = w.shape[:-1]
    w = w.reshape(*lead, 4, n, tile_h)
    w = jnp.moveaxis(w, -2, -3)            # (..., n, 4, tile_h)
    return w.reshape(*lead, 4 * H)


def prepare_language_lstm_params(w_ih, w_hh, b_ih, b_hh, *, dim_att_lstm,
                                 weight_dtype=jnp.bfloat16, tile_h=None):
    """Convert PyTorch-layout LSTMCell params into the kernel's layout (run once).

    w_ih : (4H, dim_att_lstm + dim_visual_att)   PyTorch layout
    w_hh : (4H, H)                               PyTorch layout
    b_ih, b_hh : (4H,)
    Returns a dict with:
      w_all : (dim_att_lstm + dim_visual_att + H, 4H), gate-tile-reordered, weight_dtype
      b_all : (1, 4H) fp32, pre-summed, gate-tile-reordered
      plus static layout metadata.
    """
    fourH, K_in = w_ih.shape
    H = fourH // 4
    d_a = int(dim_att_lstm)
    d_v = K_in - d_a
    assert w_hh.shape == (4 * H, H), w_hh.shape
    assert b_ih.shape == (4 * H,) and b_hh.shape == (4 * H,)

    if tile_h is None:
        tile_h = _pick_tile_h(H)
    assert H % tile_h == 0, (H, tile_h)

    # Canonical MXU layout: rows = input features [h1 | v_hat | h2], cols = 4H gates.
    w_all = jnp.concatenate([w_ih.T, w_hh.T], axis=0)          # (d_a + d_v + H, 4H)
    b_all = (b_ih + b_hh).reshape(1, 4 * H)                     # pre-summed bias

    w_all = _reorder_gate_cols(w_all, H, tile_h).astype(weight_dtype)
    b_all = _reorder_gate_cols(b_all, H, tile_h).astype(jnp.float32)

    return dict(w_all=w_all, b_all=b_all, H=H, d_a=d_a, d_v=d_v, tile_h=int(tile_h))


# --------------------------------------------------------------------------------------
# Kernel
# --------------------------------------------------------------------------------------
def _language_lstm_kernel(h1_ref, v_ref, h2_ref, c2_ref, w_ref, b_ref,
                          h_out_ref, c_out_ref):
    th = c_out_ref.shape[1]        # H-tile width handled by this grid step
    wdt = w_ref.dtype              # weight storage dtype (bf16 or fp32)

    # Tiny (B, d_a + d_v + H) activation concat built in VMEM (only B rows), then ONE matmul
    # against the pre-transposed, pre-stacked weight tile (K_total, 4*th) — canonical MXU
    # layout, fp32 accumulation.  Activations are cast to the weight dtype for the MXU.
    x = jnp.concatenate([h1_ref[...], v_ref[...], h2_ref[...]], axis=1).astype(wdt)
    gates = lax.dot_general(x, w_ref[...], (((1,), (0,)), ((), ())),
                            preferred_element_type=jnp.float32)
    gates = gates + b_ref[...]                                   # (1, 4*th) broadcast, fp32

    # Per-tile gate order (after init-time column reorder): i | f | g | o, each `th` wide.
    i_g = jax.nn.sigmoid(gates[:, 0 * th:1 * th])
    f_g = jax.nn.sigmoid(gates[:, 1 * th:2 * th])
    g_g = jnp.tanh(gates[:, 2 * th:3 * th])
    o_g = jax.nn.sigmoid(gates[:, 3 * th:4 * th])

    # Cell-state math stays in fp32 regardless of weight / IO dtype.
    c_new = f_g * c2_ref[...].astype(jnp.float32) + i_g * g_g
    h_new = o_g * jnp.tanh(c_new)

    c_out_ref[...] = c_new.astype(c_out_ref.dtype)
    h_out_ref[...] = h_new.astype(h_out_ref.dtype)


def _vmem_limit_bytes(need: int) -> int:
    """Generation-aware scoped-VMEM limit: physical VMEM minus headroom for Mosaic scratch."""
    phys = 64 << 20                                   # conservative default (v7x per-TC)
    try:
        phys = int(getattr(pltpu.get_tpu_info(), "vmem_capacity_bytes", phys))
    except Exception:
        pass
    cap = max(phys - (24 << 20), 32 << 20)            # ~40 MiB on v7x, ~104 MiB on v5e/v6e
    return int(min(max(int(need) + (4 << 20), 32 << 20), cap))


# --------------------------------------------------------------------------------------
# Per-call wrapper
# --------------------------------------------------------------------------------------
def language_lstm_forward(h2, c2, h1, v_hat, params):
    """Pallas implementation of LanguageLSTM.forward (one LSTMCell step).

    h2, c2 : (B, H)              previous hidden / cell state of the language LSTM
    h1     : (B, dim_att_lstm)   hidden state of the attention LSTM
    v_hat  : (B, dim_visual_att) attended visual feature
    params : dict from prepare_language_lstm_params (weights pre-transposed/stacked/reordered)
    Returns (h_out, c_out), each (B, H) in h2.dtype.
    """
    H, d_a, d_v, th = params["H"], params["d_a"], params["d_v"], params["tile_h"]
    w_all, b_all = params["w_all"], params["b_all"]
    B = h2.shape[0]
    K_total = d_a + d_v + H
    n_tiles = H // th
    out_dtype = h2.dtype

    assert h2.shape == (B, H) and c2.shape == (B, H)
    assert h1.shape == (B, d_a) and v_hat.shape == (B, d_v)
    assert w_all.shape == (K_total, 4 * H) and b_all.shape == (1, 4 * H)

    # VMEM budget (double-buffered BlockSpec tiles + fp32 gate slab headroom).
    wbytes = jnp.dtype(w_all.dtype).itemsize
    act_bytes = jnp.dtype(h2.dtype).itemsize
    out_bytes = jnp.dtype(out_dtype).itemsize
    need = (2 * K_total * 4 * th * wbytes            # weight tile (double-buffered)
            + 2 * 4 * th * 4                         # bias tile
            + 2 * B * (d_a + d_v + H) * act_bytes    # h1 / v_hat / h2 blocks
            + 2 * B * th * act_bytes                 # c2 tile
            + 2 * 2 * B * th * out_bytes             # h / c output tiles
            + 4 * B * 4 * th * 4)                    # fp32 gates + temps headroom
    vmem_limit = _vmem_limit_bytes(need)

    grid_spec = pltpu.PrefetchScalarGridSpec(
        num_scalar_prefetch=0,
        grid=(n_tiles,),
        in_specs=[
            pl.BlockSpec((B, d_a), lambda j: (0, 0)),        # h1 (full, reused every tile)
            pl.BlockSpec((B, d_v), lambda j: (0, 0)),        # v_hat
            pl.BlockSpec((B, H), lambda j: (0, 0)),          # h2 (full: matmul contracts all H)
            pl.BlockSpec((B, th), lambda j: (0, j)),         # c2 tile
            pl.BlockSpec((K_total, 4 * th), lambda j: (0, j)),   # weight tile [i_j|f_j|g_j|o_j]
            pl.BlockSpec((1, 4 * th), lambda j: (0, j)),         # bias tile
        ],
        out_specs=(
            pl.BlockSpec((B, th), lambda j: (0, j)),         # h_out tile
            pl.BlockSpec((B, th), lambda j: (0, j)),         # c_out tile
        ),
    )

    h_out, c_out = pl.pallas_call(
        _language_lstm_kernel,
        out_shape=(
            jax.ShapeDtypeStruct((B, H), out_dtype),
            jax.ShapeDtypeStruct((B, H), out_dtype),
        ),
        grid_spec=grid_spec,
        compiler_params=pltpu.CompilerParams(
            dimension_semantics=("parallel",),               # shards H-tiles across v7x's 2 TCs
            vmem_limit_bytes=vmem_limit,
        ),
    )(h1, v_hat, h2, c2, w_all, b_all)
    return h_out, c_out


# --------------------------------------------------------------------------------------
# Pure-JAX reference (torch.nn.LSTMCell semantics) and self-test
# --------------------------------------------------------------------------------------
def _reference_forward(h2, c2, h1, v_hat, w_ih, w_hh, b_ih, b_hh):
    x = jnp.concatenate([h1, v_hat], axis=1)
    gates = x @ w_ih.T + b_ih + h2 @ w_hh.T + b_hh
    H = h2.shape[1]
    i = jax.nn.sigmoid(gates[:, 0 * H:1 * H])
    f = jax.nn.sigmoid(gates[:, 1 * H:2 * H])
    g = jnp.tanh(gates[:, 2 * H:3 * H])
    o = jax.nn.sigmoid(gates[:, 3 * H:4 * H])
    c_out = f * c2 + i * g
    h_out = o * jnp.tanh(c_out)
    return h_out, c_out


def _make_case(key, B, d_a, d_v, H):
    k = jax.random.split(key, 8)
    bound = 1.0 / (H ** 0.5)
    w_ih = jax.random.uniform(k[0], (4 * H, d_a + d_v), jnp.float32, -bound, bound)
    w_hh = jax.random.uniform(k[1], (4 * H, H), jnp.float32, -bound, bound)
    b_ih = jax.random.uniform(k[2], (4 * H,), jnp.float32, -bound, bound)
    b_hh = jax.random.uniform(k[3], (4 * H,), jnp.float32, -bound, bound)
    h2 = jax.random.normal(k[4], (B, H), jnp.float32)
    c2 = jax.random.normal(k[5], (B, H), jnp.float32)
    h1 = jax.random.normal(k[6], (B, d_a), jnp.float32)
    v_hat = jax.random.normal(k[7], (B, d_v), jnp.float32)
    return h2, c2, h1, v_hat, w_ih, w_hh, b_ih, b_hh


if __name__ == "__main__":
    key = jax.random.PRNGKey(0)
    k_small, k_big = jax.random.split(key)

    # ---------------- Case 1: small shapes matching the module (single tile) ------------
    B, d_a, d_v, H = 2, 32, 32, 32
    h2, c2, h1, v_hat, w_ih, w_hh, b_ih, b_hh = _make_case(k_small, B, d_a, d_v, H)
    h_ref, c_ref = _reference_forward(h2, c2, h1, v_hat, w_ih, w_hh, b_ih, b_hh)

    # fp32-stored weights: must match the reference tightly.
    p_f32 = prepare_language_lstm_params(w_ih, w_hh, b_ih, b_hh,
                                         dim_att_lstm=d_a, weight_dtype=jnp.float32)
    h_out, c_out = language_lstm_forward(h2, c2, h1, v_hat, p_f32)
    jax.block_until_ready((h_out, c_out))
    assert jnp.allclose(h_out, h_ref, atol=1e-5, rtol=1e-5)
    assert jnp.allclose(c_out, c_ref, atol=1e-5, rtol=1e-5)

    # bf16-stored weights (default): activations are also down-cast to bf16 for the MXU,
    # accumulation and gate/cell math stay fp32 -> loose tolerance vs the fp32 reference.
    p_bf16 = prepare_language_lstm_params(w_ih, w_hh, b_ih, b_hh,
                                          dim_att_lstm=d_a, weight_dtype=jnp.bfloat16)
    h_out_b, c_out_b = language_lstm_forward(h2, c2, h1, v_hat, p_bf16)
    jax.block_until_ready((h_out_b, c_out_b))
    assert jnp.allclose(h_out_b, h_ref, atol=5e-2, rtol=5e-2)
    assert jnp.allclose(c_out_b, c_ref, atol=5e-2, rtol=5e-2)

    # ---------------- Case 2: lane-aligned shapes exercising the H-tiled grid path ------
    B, d_a, d_v, H = 8, 128, 128, 256
    h2, c2, h1, v_hat, w_ih, w_hh, b_ih, b_hh = _make_case(k_big, B, d_a, d_v, H)
    h_ref, c_ref = _reference_forward(h2, c2, h1, v_hat, w_ih, w_hh, b_ih, b_hh)
    p_tiled = prepare_language_lstm_params(w_ih, w_hh, b_ih, b_hh,
                                           dim_att_lstm=d_a, weight_dtype=jnp.float32,
                                           tile_h=128)          # 2 grid tiles ("parallel")
    h_out_t, c_out_t = language_lstm_forward(h2, c2, h1, v_hat, p_tiled)
    jax.block_until_ready((h_out_t, c_out_t))
    assert jnp.allclose(h_out_t, h_ref, atol=1e-4, rtol=1e-4)
    assert jnp.allclose(c_out_t, c_ref, atol=1e-4, rtol=1e-4)

    print("KERNEL_OK")
</pallas_src>

<mosaic_0001>
module attributes {stable_mosaic.version = 11 : i64} {
  func.func @_language_lstm_kernel(%arg0: i32, %arg1: memref<2x32xf32, #tpu.memory_space<vmem>>, %arg2: memref<2x32xf32, #tpu.memory_space<vmem>>, %arg3: memref<2x32xf32, #tpu.memory_space<vmem>>, %arg4: memref<2x32xf32, #tpu.memory_space<vmem>>, %arg5: memref<96x128xf32, #tpu.memory_space<vmem>>, %arg6: memref<1x128xf32, #tpu.memory_space<vmem>>, %arg7: memref<2x32xf32, #tpu.memory_space<vmem>>, %arg8: memref<2x32xf32, #tpu.memory_space<vmem>>) attributes {dimension_semantics = [#tpu.dimension_semantics<parallel>], iteration_bounds = array<i64: 1>, scalar_prefetch = 0 : i64, scratch_operands = 0 : i64, tpu.core_type = #tpu.core_type<tc>, window_params = [{pipeline_mode = #tpu.pipeline_mode<synchronous>, transform_indices = @transform_0, window_bounds = array<i64: 2, 32>}, {pipeline_mode = #tpu.pipeline_mode<synchronous>, transform_indices = @transform_1, window_bounds = array<i64: 2, 32>}, {pipeline_mode = #tpu.pipeline_mode<synchronous>, transform_indices = @transform_2, window_bounds = array<i64: 2, 32>}, {transform_indices = @transform_3, window_bounds = array<i64: 2, 32>}, {transform_indices = @transform_4, window_bounds = array<i64: 96, 128>}, {transform_indices = @transform_5, window_bounds = array<i64: 1, 128>}, {transform_indices = @transform_6, window_bounds = array<i64: 2, 32>}, {transform_indices = @transform_7, window_bounds = array<i64: 2, 32>}]} {
    %c0 = arith.constant 0 : index
    %c0_0 = arith.constant 0 : index
    %0 = vector.load %arg1[%c0, %c0_0] : memref<2x32xf32, #tpu.memory_space<vmem>>, vector<2x32xf32>
    %c0_1 = arith.constant 0 : index
    %c0_2 = arith.constant 0 : index
    %1 = vector.load %arg2[%c0_1, %c0_2] : memref<2x32xf32, #tpu.memory_space<vmem>>, vector<2x32xf32>
    %c0_3 = arith.constant 0 : index
    %c0_4 = arith.constant 0 : index
    %2 = vector.load %arg3[%c0_3, %c0_4] : memref<2x32xf32, #tpu.memory_space<vmem>>, vector<2x32xf32>
    %3 = tpu.concatenate %0, %1, %2 in 1 : vector<2x32xf32>, vector<2x32xf32>, vector<2x32xf32> -> vector<2x96xf32>
    %c0_5 = arith.constant 0 : index
    %c0_6 = arith.constant 0 : index
    %4 = vector.load %arg5[%c0_5, %c0_6] : memref<96x128xf32, #tpu.memory_space<vmem>>, vector<96x128xf32>
    %cst = arith.constant dense<0.000000e+00> : vector<2x128xf32>
    %5 = tpu.matmul %3, %4, %cst {dimension_numbers = #tpu.dot_dimension_numbers<[1], [0], [0], [1], [0, 0, 1, 1], [], []>} : vector<2x96xf32>, vector<96x128xf32>, vector<2x128xf32> -> vector<2x128xf32>
    %c0_7 = arith.constant 0 : index
    %c0_8 = arith.constant 0 : index
    %6 = vector.load %arg6[%c0_7, %c0_8] : memref<1x128xf32, #tpu.memory_space<vmem>>, vector<1x128xf32>
    %7 = vector.broadcast %6 : vector<1x128xf32> to vector<2x128xf32>
    %8 = arith.addf %5, %7 : vector<2x128xf32>
    %9 = vector.extract_strided_slice %8 {offsets = [0, 0], sizes = [2, 32], strides = [1, 1]} : vector<2x128xf32> to vector<2x32xf32>
    %10 = arith.negf %9 : vector<2x32xf32>
    %11 = math.exp %10 : vector<2x32xf32>
    %cst_9 = arith.constant 1.000000e+00 : f32
    %12 = vector.broadcast %cst_9 : f32 to vector<2x32xf32>
    %13 = arith.addf %12, %11 : vector<2x32xf32>
    %14 = arith.divf %12, %13 : vector<2x32xf32>
    %15 = vector.extract_strided_slice %8 {offsets = [0, 32], sizes = [2, 32], strides = [1, 1]} : vector<2x128xf32> to vector<2x32xf32>
    %16 = arith.negf %15 : vector<2x32xf32>
    %17 = math.exp %16 : vector<2x32xf32>
    %cst_10 = arith.constant 1.000000e+00 : f32
    %18 = vector.broadcast %cst_10 : f32 to vector<2x32xf32>
    %19 = arith.addf %18, %17 : vector<2x32xf32>
    %20 = arith.divf %18, %19 : vector<2x32xf32>
    %21 = vector.extract_strided_slice %8 {offsets = [0, 64], sizes = [2, 32], strides = [1, 1]} : vector<2x128xf32> to vector<2x32xf32>
    %22 = math.tanh %21 : vector<2x32xf32>
    %23 = vector.extract_strided_slice %8 {offsets = [0, 96], sizes = [2, 32], strides = [1, 1]} : vector<2x128xf32> to vector<2x32xf32>
    %24 = arith.negf %23 : vector<2x32xf32>
    %25 = math.exp %24 : vector<2x32xf32>
    %cst_11 = arith.constant 1.000000e+00 : f32
    %26 = vector.broadcast %cst_11 : f32 to vector<2x32xf32>
    %27 = arith.addf %26, %25 : vector<2x32xf32>
    %28 = arith.divf %26, %27 : vector<2x32xf32>
    %c0_12 = arith.constant 0 : index
    %c0_13 = arith.constant 0 : index
    %29 = vector.load %arg4[%c0_12, %c0_13] : memref<2x32xf32, #tpu.memory_space<vmem>>, vector<2x32xf32>
    %30 = arith.mulf %20, %29 : vector<2x32xf32>
    %31 = arith.mulf %14, %22 : vector<2x32xf32>
    %32 = arith.addf %30, %31 : vector<2x32xf32>
    %33 = math.tanh %32 : vector<2x32xf32>
    %34 = arith.mulf %28, %33 : vector<2x32xf32>
    %c0_14 = arith.constant 0 : index
    %c0_15 = arith.constant 0 : index
    %35 = vector.load %arg8[%c0_14, %c0_15] : memref<2x32xf32, #tpu.memory_space<vmem>>, vector<2x32xf32>
    tpu.vector_store %arg8[%c0_14, %c0_15], %32 {strides = array<i32>} : memref<2x32xf32, #tpu.memory_space<vmem>>, vector<2x32xf32>,
    %c0_16 = arith.constant 0 : index
    %c0_17 = arith.constant 0 : index
    %36 = vector.load %arg7[%c0_16, %c0_17] : memref<2x32xf32, #tpu.memory_space<vmem>>, vector<2x32xf32>
    tpu.vector_store %arg7[%c0_16, %c0_17], %34 {strides = array<i32>} : memref<2x32xf32, #tpu.memory_space<vmem>>, vector<2x32xf32>,
    return
  }
  func.func @transform_0(%arg0: i32) -> (i32, i32) {
    %c0_i32 = arith.constant 0 : i32
    %c0_i32_0 = arith.constant 0 : i32
    %c0_i32_1 = arith.constant 0 : i32
    return %c0_i32, %c0_i32_0 : i32, i32
  }
  func.func @transform_1(%arg0: i32) -> (i32, i32) {
    %c0_i32 = arith.constant 0 : i32
    %c0_i32_0 = arith.constant 0 : i32
    %c0_i32_1 = arith.constant 0 : i32
    return %c0_i32, %c0_i32_0 : i32, i32
  }
  func.func @transform_2(%arg0: i32) -> (i32, i32) {
    %c0_i32 = arith.constant 0 : i32
    %c0_i32_0 = arith.constant 0 : i32
    %c0_i32_1 = arith.constant 0 : i32
    return %c0_i32, %c0_i32_0 : i32, i32
  }
  func.func @transform_3(%arg0: i32) -> (i32, i32) {
    %c0_i32 = arith.constant 0 : i32
    %c0_i32_0 = arith.constant 0 : i32
    return %c0_i32, %arg0 : i32, i32
  }
  func.func @transform_4(%arg0: i32) -> (i32, i32) {
    %c0_i32 = arith.constant 0 : i32
    %c0_i32_0 = arith.constant 0 : i32
    return %c0_i32, %arg0 : i32, i32
  }
  func.func @transform_5(%arg0: i32) -> (i32, i32) {
    %c0_i32 = arith.constant 0 : i32
    %c0_i32_0 = arith.constant 0 : i32
    return %c0_i32, %arg0 : i32, i32
  }
  func.func @transform_6(%arg0: i32) -> (i32, i32) {
    %c0_i32 = arith.constant 0 : i32
    %c0_i32_0 = arith.constant 0 : i32
    return %c0_i32, %arg0 : i32, i32
  }
  func.func @transform_7(%arg0: i32) -> (i32, i32) {
    %c0_i32 = arith.constant 0 : i32
    %c0_i32_0 = arith.constant 0 : i32
    return %c0_i32, %arg0 : i32, i32
  }
}

</mosaic_0001>

<bundles_post_ra>
// kernel: tpu_custom_call.1
= control target key start
LH: loop header
LB: loop body
LE: loop exit
PB: predicated region body
PF: predicated region fallthrough
CT: control target
= control target key end

     0   :  { %13 = vsyncpa [#allocation3], 0  ;;  %s536_s0 = inlined_call_operand.hbm [shape: f32[2,32], index: 0, kind: input, shape index: {}]   ;;  %s537_s1 = inlined_call_operand.vmem [shape: f32[2,32], index: 1, kind: input, shape index: {}]   ;;  %s538_s2 = inlined_call_operand.vmem [shape: f32[2,32], index: 2, kind: input, shape index: {}]   ;;  %s539_s3 = inlined_call_operand.vmem [shape: f32[2,32], index: 3, kind: input, shape index: {}]   ;;  %s540_s4 = inlined_call_operand.hbm [shape: f32[96,128], index: 4, kind: input, shape index: {}]   ;;  %s541_s5 = inlined_call_operand.vmem [shape: f32[1,128], index: 5, kind: input, shape index: {}]   ;;  %s542_s6 = inlined_call_operand.hbm [shape: f32[2,32], index: 6, kind: output, shape index: {0}]   ;;  %s543_s7 = inlined_call_operand.hbm [shape: f32[2,32], index: 7, kind: output, shape index: {1}]  }
   0x1   :  { %14 = vsyncpa [#allocation6], 0 }
   0x2   :  { %15 = vsyncpa [#allocation4], 0 }
   0x3   :  { %16 = vsyncpa [#allocation9], 0  ;;  %s408_s24 = smov [#allocation2]   ;;  %s409_s26 = smov [#allocation5]  }
   0x4   :  { %s23_s25 = sshll.u32 %s408_s24, 4  ;;  %s38_s27 = sshll.u32 %s409_s26, 4  ;;  %s24_s25 = int_to_ptr.vmem [resolvable:$true] %s23_s25  ;;  %s460_s27 = int_to_ptr.vmem [resolvable:$true] %s38_s27 }
   0x5   :  { %s312_s30 = scalar_lea.hbm %s536_s0, 32 }
   0x6   :  { %p313_p0 = scmp.ne.s32.totalorder %s536_s0, %s312_s30  ;;  %p316_p1 = scmp.lt.u32.totalorder %s312_s30, %s536_s0 }
   0x8   :  { %p318_p2 = pnand %p316_p1, %p313_p0 }
   0xa   :  { %321 = shalt.err (!%p318_p2)
}
   0xb   :  { %s322_s12 = scalar_lea.vmem %s24_s25, 32  ;;  %p327_p4 = scmp.lt.s32.totalorder %s24_s25, %s24_s25 }
   0xc   :  { %p323_p3 = scmp.ne.s32.totalorder %s24_s25, %s322_s12  ;;  %p328_p5 = scmp.lt.s32.totalorder %s322_s12, %s322_s12 }
   0xe   :  { %p329_p6 = por %p328_p5, %p327_p4 }
  0x10   :  { %p330_p7 = pnand %p329_p6, %p323_p3 }
  0x12   :  { %333 = shalt.err (!%p330_p7)
}
  0x13   :  { %26 = dma.hbm_to_vmem [thread:$0]  %s536_s0, 32, %s24_s25, [#allocation3]  }
  0x14   :  { %s334_s17 = scalar_lea.hbm %s540_s4, 1536 }
  0x15   :  { %p335_p8 = scmp.ne.s32.totalorder %s540_s4, %s334_s17  ;;  %p338_p9 = scmp.lt.u32.totalorder %s334_s17, %s540_s4 }
  0x17   :  { %p340_p10 = pnand %p338_p9, %p335_p8 }
  0x19   :  { %343 = shalt.err (!%p340_p10)
}
  0x1a   :  { %s344_s22 = scalar_lea.vmem %s460_s27, 1536  ;;  %p349_p12 = scmp.lt.s32.totalorder %s460_s27, %s460_s27 }
  0x1b   :  { %p345_p11 = scmp.ne.s32.totalorder %s460_s27, %s344_s22  ;;  %p350_p13 = scmp.lt.s32.totalorder %s344_s22, %s344_s22 }
  0x1d   :  { %p351_p0 = por %p350_p13, %p349_p12 }
  0x1f   :  { %p352_p1 = pnand %p351_p0, %p345_p11 }
  0x21   :  { %355 = shalt.err (!%p352_p1)
}
  0x22   :  { %s410_s0 = smov 128   ;;  %s411_s23 = smov 8  }
  0x23   :  { %44 = dma.hbm_to_vmem [thread:$0]  %s540_s4, 1536, %s460_s27, [#allocation6], %s410_s0, %s410_s0, %s411_s23  }
  0x24   :  { %400 = dma.done.wait [#allocation3], 32  }
  0x25   :  { %401 = vsyncadd [#allocation3], 4294967264 }
  0x26   :  { %402 = dma.done.wait [#allocation6], 1536  }
  0x27   :  { %403 = vsyncadd [#allocation6], 4294965760  ;;  %v412_v0 = vmov 0.0|0.0   ;;  %vm413_vm0 = vmmov 0   ;;  %v414_v1 = vmov 0.0   ;;  %v68_v3 = vld [vmem:[#allocation5] sm:$0xff] }
  0x28   :  { %274 = vmatprep.subr.bf16.mxu0 %v412_v0  ;;  %271 = vmatprep.mubr.msk.f32.mxu0 %vm413_vm0, %v414_v1  ;;  %v54_v2 = vld [vmem:[%s537_s1] sm:$0x3]  ;;  %s415_s29 = smov 32   ;;  %v69_v4 = vld [vmem:[#allocation5 + $0x8] sm:$0xff]  ;;  %v70_v5 = vld [vmem:[#allocation5 + $0x10] sm:$0xff]  ;;  %s416_s30 = smov 64  }
  0x29   :  { %57 = vrot.lane.b32.xlu0 %v54_v2, %s415_s29  ;;  %v71_v6 = vld [vmem:[#allocation5 + $0x18] sm:$0xff]  ;;  %v275_v8 = vpack.c.bf16 %v69_v4, %v68_v3  ;;  %v72_v10 = vld [vmem:[#allocation5 + $0x20] sm:$0xff]  ;;  %v73_v11 = vld [vmem:[#allocation5 + $0x28] sm:$0xff]  ;;  %vm64_vm1 = vcmask 261120   ;;  %vm66_vm2 = vcmask 523264   ;;  %vm87_vm3 = vcmask 785408  }
  0x2a   :  { %v55_v7 = vld [vmem:[%s538_s2] sm:$0x3]  ;;  %v278_v9 = vpack.c.bf16 %v71_v6, %v70_v5  ;;  %v281_v12 = vpack.c.bf16 %v73_v11, %v72_v10  ;;  %v74_v13 = vld [vmem:[#allocation5 + $0x30] sm:$0xff]  ;;  %v76_v16 = vld [vmem:[#allocation5 + $0x40] sm:$0xff]  ;;  %vm194_vm4 = vcmask 254976  }
  0x2b   :  { %276 = vmatpush3.bf16.msra.mxu0 %v275_v8  ;;  %v75_v14 = vld [vmem:[#allocation5 + $0x38] sm:$0xff]  ;;  %v77_v17 = vld [vmem:[#allocation5 + $0x48] sm:$0xff]  ;;  %v78_v19 = vld [vmem:[#allocation5 + $0x50] sm:$0xff] }
  0x2c   :  { %277 = vmatprep.subr.bf16.mxu0 %v412_v0  ;;  %v284_v15 = vpack.c.bf16 %v75_v14, %v74_v13  ;;  %v287_v18 = vpack.c.bf16 %v77_v17, %v76_v16  ;;  %v79_v20 = vld [vmem:[#allocation5 + $0x58] sm:$0xff] }
  0x2d   :  { %61 = vrot.lane.b32.xlu0 %v55_v7, %s416_s30  ;;  %v290_v21 = vpack.c.bf16 %v79_v20, %v78_v19  ;;  %v53_v23 = vld [vmem:[#allocation2] sm:$0x3] }
  0x2e   :  { %v231_v27 = vld [vmem:[%s541_s5] ss:$0 sm:$0xff]  ;;  %s417_s5 = smov 96  }
  0x2f   :  { %279 = vmatpush3.bf16.msra.mxu0 %v278_v9  ;;  %v168_v32 = vld [vmem:[%s539_s3] sm:$0x3]  ;;  %s418_s3 = smov [#allocation8]  }
  0x30   :  { %280 = vmatprep.subr.bf16.mxu0 %v412_v0  ;;  %s217_s10 = sshll.u32 %s418_s3, 4  ;;  %s218_s10 = int_to_ptr.vmem [resolvable:$true] %s217_s10 }
  0x31   :  { %s356_s11 = scalar_lea.vmem %s218_s10, 32  ;;  %p361_p3 = scmp.lt.s32.totalorder %s218_s10, %s218_s10 }
  0x32   :  { %p357_p2 = scmp.ne.s32.totalorder %s218_s10, %s356_s11  ;;  %p362_p4 = scmp.lt.s32.totalorder %s356_s11, %s356_s11 }
  0x33   :  { %282 = vmatpush3.bf16.msra.mxu0 %v281_v12 }
  0x34   :  { %283 = vmatprep.subr.bf16.mxu0 %v412_v0  ;;  %p363_p5 = por %p362_p4, %p361_p3 }
  0x36   :  { %p364_p6 = pnand %p363_p5, %p357_p2 }
  0x37   :  { %285 = vmatpush3.bf16.msra.mxu0 %v284_v15 }
  0x38   :  { %286 = vmatprep.subr.bf16.mxu0 %v412_v0 }
  0x3b   :  { %288 = vmatpush3.bf16.msra.mxu0 %v287_v18 }
  0x3c   :  { %289 = vmatprep.subr.bf16.mxu0 %v412_v0 }
  0x3f   :  { %291 = vmatpush3.bf16.msra.mxu0 %v290_v21 }
  0x9b   :  { %v58_v22 = vpop.permute.xlu0 %57 }
  0x9c   :  { %v65_v24 = vsel %vm64_vm1, %v53_v23, %v58_v22 }
  0x9f   :  { %v62_v25 = vpop.permute.xlu0 %61 }
  0xa0   :  { %v67_v26 = vsel %vm66_vm2, %v65_v24, %v62_v25 }
  0xa1   :  { %272 = vmatmul.mubr.msk.f32.vlgmr.msra.gmra.mrb[0].mxu0 %vm87_vm3, %v67_v26 }
 0x174   :  { %v157_v28 = vpop.f32.mrb[0].mxu0 }
 0x175   :  { %v158_v29 = vadd.f32 %v231_v27, %v157_v28  ;;  %v273_v30 = vpop.f32.mrb[1].mxu0 }
 0x177   :  { %304 = vtanh.f32 %v158_v29  ;;  %v233_v33 = vmul.f32 -1.442695, %v158_v29 }
 0x179   :  { %306 = vpow2.f32 %v233_v33 }
 0x181   :  { %v305_v31 = vpop.eup %304 }
 0x182   :  { %175 = vrot.lane.b32.xlu1 %v305_v31, %s416_s30 }
 0x183   :  { %v307_v34 = vpop.eup %306 }
 0x184   :  { %v164_v35 = vadd.f32 1.0, %v307_v34 }
 0x186   :  { %170 = vrot.lane.b32.xlu1 %v168_v32, %s415_s29  ;;  %308 = vrcp.f32 %v164_v35 }
 0x190   :  { %v309_v36 = vpop.eup %308 }
 0x1f4   :  { %v176_v37 = vpop.permute.xlu1 %175 }
 0x1f5   :  { %v178_v38 = vmul.f32 %v309_v36, %v176_v37 }
 0x1f7   :  { %180 = vrot.lane.b32.xlu0 %v178_v38, %s415_s29 }
 0x1f8   :  { %v171_v39 = vpop.permute.xlu1 %170 }
 0x1f9   :  { %v173_v40 = vmul.f32 %v309_v36, %v171_v39 }
 0x269   :  { %v181_v41 = vpop.permute.xlu0 %180 }
 0x26a   :  { %v183_v42 = vadd.f32 %v181_v41, %v173_v40 }
 0x26c   :  { %310 = vtanh.f32 %v183_v42  ;;  %191 = vrot.lane.b32.xlu0 %v183_v42, %s417_s5 }
 0x276   :  { %v311_v43 = vpop.eup %310 }
 0x277   :  { %186 = vrot.lane.b32.xlu1 %v311_v43, %s416_s30 }
 0x2de   :  { %v192_v44 = vpop.permute.xlu0 %191 }
 0x2df   :  { %195 = vst.msk [vmem:[#allocation8] sm:$0x3] %vm194_vm4, %v192_v44 }
 0x2e0   :  { %367 = shalt.err (!%p364_p6)
}
 0x2e1   :  { %s368_s14 = scalar_lea.hbm %s543_s7, 32 }
 0x2e2   :  { %p369_p7 = scmp.ne.s32.totalorder %s543_s7, %s368_s14  ;;  %p372_p8 = scmp.lt.u32.totalorder %s368_s14, %s543_s7 }
 0x2e4   :  { %p374_p9 = pnand %p372_p8, %p369_p7 }
 0x2e6   :  { %377 = shalt.err (!%p374_p9)
}
 0x2e7   :  { %220 = dma.vmem_to_hbm [thread:$0]  %s218_s10, 32, %s543_s7, [#allocation9]  }
 0x2e8   :  { %s419_s21 = smov [#allocation7]  }
 0x2e9   :  { %v187_v45 = vpop.permute.xlu1 %186  ;;  %s207_s22 = sshll.u32 %s419_s21, 4  ;;  %s208_s22 = int_to_ptr.vmem [resolvable:$true] %s207_s22 }
 0x2ea   :  { %v189_v46 = vmul.f32 %v309_v36, %v187_v45  ;;  %s378_s0 = scalar_lea.vmem %s208_s22, 32  ;;  %p383_p11 = scmp.lt.s32.totalorder %s208_s22, %s208_s22 }
 0x2eb   :  { %p379_p10 = scmp.ne.s32.totalorder %s208_s22, %s378_s0  ;;  %p384_p12 = scmp.lt.s32.totalorder %s378_s0, %s378_s0 }
 0x2ec   :  { %197 = vrot.lane.b32.xlu1 %v189_v46, %s415_s29 }
 0x2ed   :  { %p385_p13 = por %p384_p12, %p383_p11 }
 0x2ef   :  { %p386_p0 = pnand %p385_p13, %p379_p10 }
 0x35e   :  { %v198_v47 = vpop.permute.xlu1 %197 }
 0x35f   :  { %200 = vst.msk [vmem:[#allocation7] sm:$0x3] %vm194_vm4, %v198_v47 }
 0x360   :  { %389 = shalt.err (!%p386_p0)
}
 0x361   :  { %s390_s7 = scalar_lea.hbm %s542_s6, 32 }
 0x362   :  { %p391_p1 = scmp.ne.s32.totalorder %s542_s6, %s390_s7  ;;  %p394_p2 = scmp.lt.u32.totalorder %s390_s7, %s542_s6 }
 0x364   :  { %p396_p3 = pnand %p394_p2, %p391_p1 }
 0x366   :  { %399 = shalt.err (!%p396_p3)
}
 0x367   :  { %210 = dma.vmem_to_hbm [thread:$0]  %s208_s22, 32, %s542_s6, [#allocation4]  }
 0x368   :  { %404 = dma.done.wait [#allocation4], 32  }
 0x369   :  { %405 = vsyncadd [#allocation4], 4294967264 }
 0x36a   :  { %406 = dma.done.wait [#allocation9], 32  }
 0x36b   :  { %407 = vsyncadd [#allocation9], 4294967264 }
 0x36c   :  { %227 = vsyncpa [#allocation3], 1 }
 0x36d   :  { %228 = vsyncpa [#allocation6], 1 }
 0x36e   :  { %229 = vsyncpa [#allocation4], 1 }
 0x36f   :  { %230 = vsyncpa [#allocation9], 1 }

</bundles_post_ra>
